<compile_context>
chip_gen: v7x
topology: tpu7x:2x2x1
jax: 0.10.0
libtpu: 0.0.40
codegen_flags: <defaults>
</compile_context>

<pallas_src>
import functools

import jax
import jax.numpy as jnp
from jax import lax
from jax.experimental import pallas as pl
from jax.experimental.pallas import tpu as pltpu


def _diou_kernel(s_ref, t_ref, out_ref, *, n_valid, rows_blk, eps, needs_mask):
    """One grid step: (4, rows_blk, 128) coord planes -> (8, 128) partial sum."""
    i = pl.program_id(0)

    sx0 = s_ref[0].astype(jnp.float32)
    sy0 = s_ref[1].astype(jnp.float32)
    sx1 = s_ref[2].astype(jnp.float32)
    sy1 = s_ref[3].astype(jnp.float32)
    tx0 = t_ref[0].astype(jnp.float32)
    ty0 = t_ref[1].astype(jnp.float32)
    tx1 = t_ref[2].astype(jnp.float32)
    ty1 = t_ref[3].astype(jnp.float32)

    zero = jnp.float32(0.0)

    area1 = jnp.abs((sx1 - sx0) * (sy1 - sy0))
    area2 = jnp.abs((tx1 - tx0) * (ty1 - ty0))

    iw = jnp.maximum(jnp.minimum(sx1, tx1) - jnp.maximum(sx0, tx0), zero)
    ih = jnp.maximum(jnp.minimum(sy1, ty1) - jnp.maximum(sy0, ty0), zero)
    inter = iw * ih
    union = jnp.maximum(area1 + area2 - inter, zero)

    # center-to-center distance and enclosing-box extents
    cdx = (tx1 + tx0 - sx1 - sx0) * jnp.float32(0.5)
    cdy = (ty1 + ty0 - sy1 - sy0) * jnp.float32(0.5)
    odx = jnp.maximum(sx1, tx1) - jnp.minimum(sx0, tx0)
    ody = jnp.maximum(sy1, ty1) - jnp.minimum(sy0, ty0)

    diag_min = jnp.float32(1e-6)
    inter_diag = jnp.maximum(jnp.sqrt(cdx * cdx + cdy * cdy), diag_min)
    # 1 / clamp(sqrt(o2), 1e-6) == min(rsqrt(o2), 1e6): one EUP op vs sqrt+div.
    inv_outer = jnp.minimum(lax.rsqrt(odx * odx + ody * ody), jnp.float32(1e6))

    dious = (jnp.float32(1.0)
             - inter / (union + jnp.float32(eps))
             + inter_diag * inv_outer)
    dious = jnp.clip(dious, jnp.float32(-1.0), jnp.float32(1.0))

    if needs_mask:  # static Python flag: emitted only when padded lanes exist
        row = lax.broadcasted_iota(jnp.int32, dious.shape, 0)
        lane = lax.broadcasted_iota(jnp.int32, dious.shape, 1)
        idx = (i * rows_blk + row) * 128 + lane
        dious = jnp.where(idx < n_valid, dious, zero)

    # Per-block partial sum folded onto the native (8, 128) tile: the reshape
    # is a sublane-aligned regroup (no-op layout) and the sum over the leading
    # axis is a chain of plain VPU vector adds — no XLU, no scalar round-trip.
    out_ref[...] = jnp.sum(dious.reshape(rows_blk // 8, 8, 128), axis=0)


def diou_loss(score, target, eps=1e-6, block_rows=1024):
    """DIoU loss matching the PyTorch module's forward. Returns a scalar."""
    assert score.shape == target.shape and score.shape[-1] == 4
    b, d, _ = score.shape
    n = b * d

    rows = pl.cdiv(n, 128)                              # lane-dense rows of 128 boxes
    rows_blk = max(8, min(int(block_rows), ((rows + 7) // 8) * 8))
    rows_pad = ((rows + rows_blk - 1) // rows_blk) * rows_blk
    n_pad = rows_pad * 128
    num_blocks = rows_pad // rows_blk

    def to_planes(a):
        # (B, D, 4) -> (4, rows_pad, 128): one dense lane-major plane per coord.
        flat = a.reshape(n, 4)
        if n_pad != n:
            flat = jnp.pad(flat, ((0, n_pad - n), (0, 0)))
        return jnp.transpose(flat.reshape(rows_pad, 128, 4), (2, 0, 1))

    s_planes = to_planes(score)     # dtype preserved; cast happens in-kernel
    t_planes = to_planes(target)

    kernel = functools.partial(
        _diou_kernel, n_valid=n, rows_blk=rows_blk, eps=float(eps),
        needs_mask=(n_pad != n))

    partials = pl.pallas_call(
        kernel,
        out_shape=jax.ShapeDtypeStruct((num_blocks * 8, 128), jnp.float32),
        grid=(num_blocks,),
        in_specs=[pl.BlockSpec((4, rows_blk, 128), lambda i: (0, i, 0)),
                  pl.BlockSpec((4, rows_blk, 128), lambda i: (0, i, 0))],
        out_specs=pl.BlockSpec((8, 128), lambda i: (i, 0)),
        compiler_params=pltpu.CompilerParams(
            dimension_semantics=("parallel",)),     # megacore-shardable on v7x
    )(s_planes, t_planes)

    return jnp.sum(partials) / jnp.float32(n)


def _reference_loss(score, target, eps=1e-6):
    # Pure-JAX re-implementation of the PyTorch forward, for verification.
    s = score.astype(jnp.float32)
    t = target.astype(jnp.float32)
    area1 = jnp.abs((s[..., 2] - s[..., 0]) * (s[..., 3] - s[..., 1]))
    area2 = jnp.abs((t[..., 2] - t[..., 0]) * (t[..., 3] - t[..., 1]))
    iw = jnp.maximum(jnp.minimum(s[..., 2], t[..., 2])
                     - jnp.maximum(s[..., 0], t[..., 0]), 0.0)
    ih = jnp.maximum(jnp.minimum(s[..., 3], t[..., 3])
                     - jnp.maximum(s[..., 1], t[..., 1]), 0.0)
    inter = iw * ih
    union = jnp.maximum(area1 + area2 - inter, 0.0)
    cx1 = (s[..., 2] + s[..., 0]) / 2
    cy1 = (s[..., 3] + s[..., 1]) / 2
    cx2 = (t[..., 2] + t[..., 0]) / 2
    cy2 = (t[..., 3] + t[..., 1]) / 2
    odx = jnp.maximum(s[..., 2], t[..., 2]) - jnp.minimum(s[..., 0], t[..., 0])
    ody = jnp.maximum(s[..., 3], t[..., 3]) - jnp.minimum(s[..., 1], t[..., 1])
    inter_diag = jnp.maximum(jnp.sqrt((cx2 - cx1) ** 2 + (cy2 - cy1) ** 2), 1e-6)
    outer_diag = jnp.maximum(jnp.sqrt(odx ** 2 + ody ** 2), 1e-6)
    dious = 1.0 - inter / (union + eps) + inter_diag / outer_diag
    dious = jnp.clip(dious, -1.0, 1.0)
    return jnp.mean(jnp.sum(dious, axis=1) / s.shape[1])


if __name__ == "__main__":
    key = jax.random.PRNGKey(0)
    k1, k2, k3, k4 = jax.random.split(key, 4)

    # Small case consistent with the module: (batch=2, boxes=16, coords=4).
    score = jax.random.uniform(k1, (2, 16, 4), dtype=jnp.float32)
    target = jax.random.uniform(k2, (2, 16, 4), dtype=jnp.float32)
    loss = jax.block_until_ready(jax.jit(diou_loss)(score, target))
    ref = _reference_loss(score, target)
    assert jnp.allclose(loss, ref, atol=1e-5, rtol=1e-4), (loss, ref)

    # Larger case exercising the multi-block grid + padding-mask path.
    score2 = jax.random.uniform(k3, (8, 777, 4), dtype=jnp.float32)
    target2 = jax.random.uniform(k4, (8, 777, 4), dtype=jnp.float32)
    loss2 = jax.block_until_ready(
        jax.jit(lambda a, b: diou_loss(a, b, block_rows=16))(score2, target2))
    ref2 = _reference_loss(score2, target2)
    assert jnp.allclose(loss2, ref2, atol=1e-5, rtol=1e-4), (loss2, ref2)

    print("KERNEL_OK")
</pallas_src>

<mosaic_0001>
module attributes {stable_mosaic.version = 11 : i64} {
  func.func @_diou_kernel(%arg0: i32, %arg1: memref<4x8x128xf32, #tpu.memory_space<vmem>>, %arg2: memref<4x8x128xf32, #tpu.memory_space<vmem>>, %arg3: memref<8x128xf32, #tpu.memory_space<vmem>>) attributes {dimension_semantics = [#tpu.dimension_semantics<parallel>], iteration_bounds = array<i64: 1>, scalar_prefetch = 0 : i64, scratch_operands = 0 : i64, tpu.core_type = #tpu.core_type<tc>, window_params = [{transform_indices = @transform_0, window_bounds = array<i64: 4, 8, 128>}, {transform_indices = @transform_1, window_bounds = array<i64: 4, 8, 128>}, {transform_indices = @transform_2, window_bounds = array<i64: 8, 128>}]} {
    %c0 = arith.constant 0 : index
    %c0_0 = arith.constant 0 : index
    %c0_1 = arith.constant 0 : index
    %0 = vector.load %arg1[%c0, %c0_0, %c0_1] : memref<4x8x128xf32, #tpu.memory_space<vmem>>, vector<1x8x128xf32>
    %1 = vector.shape_cast %0 : vector<1x8x128xf32> to vector<8x128xf32>
    %c1 = arith.constant 1 : index
    %c0_2 = arith.constant 0 : index
    %c0_3 = arith.constant 0 : index
    %2 = vector.load %arg1[%c1, %c0_2, %c0_3] : memref<4x8x128xf32, #tpu.memory_space<vmem>>, vector<1x8x128xf32>
    %3 = vector.shape_cast %2 : vector<1x8x128xf32> to vector<8x128xf32>
    %c2 = arith.constant 2 : index
    %c0_4 = arith.constant 0 : index
    %c0_5 = arith.constant 0 : index
    %4 = vector.load %arg1[%c2, %c0_4, %c0_5] : memref<4x8x128xf32, #tpu.memory_space<vmem>>, vector<1x8x128xf32>
    %5 = vector.shape_cast %4 : vector<1x8x128xf32> to vector<8x128xf32>
    %c3 = arith.constant 3 : index
    %c0_6 = arith.constant 0 : index
    %c0_7 = arith.constant 0 : index
    %6 = vector.load %arg1[%c3, %c0_6, %c0_7] : memref<4x8x128xf32, #tpu.memory_space<vmem>>, vector<1x8x128xf32>
    %7 = vector.shape_cast %6 : vector<1x8x128xf32> to vector<8x128xf32>
    %c0_8 = arith.constant 0 : index
    %c0_9 = arith.constant 0 : index
    %c0_10 = arith.constant 0 : index
    %8 = vector.load %arg2[%c0_8, %c0_9, %c0_10] : memref<4x8x128xf32, #tpu.memory_space<vmem>>, vector<1x8x128xf32>
    %9 = vector.shape_cast %8 : vector<1x8x128xf32> to vector<8x128xf32>
    %c1_11 = arith.constant 1 : index
    %c0_12 = arith.constant 0 : index
    %c0_13 = arith.constant 0 : index
    %10 = vector.load %arg2[%c1_11, %c0_12, %c0_13] : memref<4x8x128xf32, #tpu.memory_space<vmem>>, vector<1x8x128xf32>
    %11 = vector.shape_cast %10 : vector<1x8x128xf32> to vector<8x128xf32>
    %c2_14 = arith.constant 2 : index
    %c0_15 = arith.constant 0 : index
    %c0_16 = arith.constant 0 : index
    %12 = vector.load %arg2[%c2_14, %c0_15, %c0_16] : memref<4x8x128xf32, #tpu.memory_space<vmem>>, vector<1x8x128xf32>
    %13 = vector.shape_cast %12 : vector<1x8x128xf32> to vector<8x128xf32>
    %c3_17 = arith.constant 3 : index
    %c0_18 = arith.constant 0 : index
    %c0_19 = arith.constant 0 : index
    %14 = vector.load %arg2[%c3_17, %c0_18, %c0_19] : memref<4x8x128xf32, #tpu.memory_space<vmem>>, vector<1x8x128xf32>
    %15 = vector.shape_cast %14 : vector<1x8x128xf32> to vector<8x128xf32>
    %16 = arith.subf %5, %1 : vector<8x128xf32>
    %17 = arith.subf %7, %3 : vector<8x128xf32>
    %18 = arith.mulf %16, %17 : vector<8x128xf32>
    %19 = math.absf %18 : vector<8x128xf32>
    %20 = arith.subf %13, %9 : vector<8x128xf32>
    %21 = arith.subf %15, %11 : vector<8x128xf32>
    %22 = arith.mulf %20, %21 : vector<8x128xf32>
    %23 = math.absf %22 : vector<8x128xf32>
    %24 = arith.minimumf %5, %13 : vector<8x128xf32>
    %25 = arith.maximumf %1, %9 : vector<8x128xf32>
    %26 = arith.subf %24, %25 : vector<8x128xf32>
    %cst = arith.constant 0.000000e+00 : f32
    %27 = vector.broadcast %cst : f32 to vector<8x128xf32>
    %28 = arith.maximumf %26, %27 : vector<8x128xf32>
    %29 = arith.minimumf %7, %15 : vector<8x128xf32>
    %30 = arith.maximumf %3, %11 : vector<8x128xf32>
    %31 = arith.subf %29, %30 : vector<8x128xf32>
    %cst_20 = arith.constant 0.000000e+00 : f32
    %32 = vector.broadcast %cst_20 : f32 to vector<8x128xf32>
    %33 = arith.maximumf %31, %32 : vector<8x128xf32>
    %34 = arith.mulf %28, %33 : vector<8x128xf32>
    %35 = arith.addf %19, %23 : vector<8x128xf32>
    %36 = arith.subf %35, %34 : vector<8x128xf32>
    %cst_21 = arith.constant 0.000000e+00 : f32
    %37 = vector.broadcast %cst_21 : f32 to vector<8x128xf32>
    %38 = arith.maximumf %36, %37 : vector<8x128xf32>
    %39 = arith.addf %13, %9 : vector<8x128xf32>
    %40 = arith.subf %39, %5 : vector<8x128xf32>
    %41 = arith.subf %40, %1 : vector<8x128xf32>
    %cst_22 = arith.constant 5.000000e-01 : f32
    %42 = vector.broadcast %cst_22 : f32 to vector<8x128xf32>
    %43 = arith.mulf %41, %42 : vector<8x128xf32>
    %44 = arith.addf %15, %11 : vector<8x128xf32>
    %45 = arith.subf %44, %7 : vector<8x128xf32>
    %46 = arith.subf %45, %3 : vector<8x128xf32>
    %cst_23 = arith.constant 5.000000e-01 : f32
    %47 = vector.broadcast %cst_23 : f32 to vector<8x128xf32>
    %48 = arith.mulf %46, %47 : vector<8x128xf32>
    %49 = arith.maximumf %5, %13 : vector<8x128xf32>
    %50 = arith.minimumf %1, %9 : vector<8x128xf32>
    %51 = arith.subf %49, %50 : vector<8x128xf32>
    %52 = arith.maximumf %7, %15 : vector<8x128xf32>
    %53 = arith.minimumf %3, %11 : vector<8x128xf32>
    %54 = arith.subf %52, %53 : vector<8x128xf32>
    %55 = arith.mulf %43, %43 : vector<8x128xf32>
    %56 = arith.mulf %48, %48 : vector<8x128xf32>
    %57 = arith.addf %55, %56 : vector<8x128xf32>
    %58 = math.sqrt %57 : vector<8x128xf32>
    %cst_24 = arith.constant 9.99999997E-7 : f32
    %59 = vector.broadcast %cst_24 : f32 to vector<8x128xf32>
    %60 = arith.maximumf %58, %59 : vector<8x128xf32>
    %61 = arith.mulf %51, %51 : vector<8x128xf32>
    %62 = arith.mulf %54, %54 : vector<8x128xf32>
    %63 = arith.addf %61, %62 : vector<8x128xf32>
    %64 = math.rsqrt %63 : vector<8x128xf32>
    %cst_25 = arith.constant 1.000000e+06 : f32
    %65 = vector.broadcast %cst_25 : f32 to vector<8x128xf32>
    %66 = arith.minimumf %64, %65 : vector<8x128xf32>
    %cst_26 = arith.constant 9.99999997E-7 : f32
    %67 = vector.broadcast %cst_26 : f32 to vector<8x128xf32>
    %68 = arith.addf %38, %67 : vector<8x128xf32>
    %69 = arith.divf %34, %68 : vector<8x128xf32>
    %cst_27 = arith.constant 1.000000e+00 : f32
    %70 = vector.broadcast %cst_27 : f32 to vector<8x128xf32>
    %71 = arith.subf %70, %69 : vector<8x128xf32>
    %72 = arith.mulf %60, %66 : vector<8x128xf32>
    %73 = arith.addf %71, %72 : vector<8x128xf32>
    %cst_28 = arith.constant -1.000000e+00 : f32
    %cst_29 = arith.constant 1.000000e+00 : f32
    %74 = vector.broadcast %cst_28 : f32 to vector<8x128xf32>
    %75 = arith.maximumf %74, %73 : vector<8x128xf32>
    %76 = vector.broadcast %cst_29 : f32 to vector<8x128xf32>
    %77 = arith.minimumf %76, %75 : vector<8x128xf32>
    %78 = tpu.iota {dimensions = array<i32: 0>} : vector<8x128xi32>
    %79 = tpu.iota {dimensions = array<i32: 1>} : vector<8x128xi32>
    %c8_i32 = arith.constant 8 : i32
    %80 = arith.muli %arg0, %c8_i32 : i32
    %81 = vector.broadcast %80 : i32 to vector<8x128xi32>
    %82 = arith.addi %81, %78 : vector<8x128xi32>
    %c128_i32 = arith.constant 128 : i32
    %83 = vector.broadcast %c128_i32 : i32 to vector<8x128xi32>
    %84 = arith.muli %82, %83 : vector<8x128xi32>
    %85 = arith.addi %84, %79 : vector<8x128xi32>
    %c32_i32 = arith.constant 32 : i32
    %86 = vector.broadcast %c32_i32 : i32 to vector<8x128xi32>
    %87 = arith.cmpi slt, %85, %86 : vector<8x128xi32>
    %cst_30 = arith.constant 0.000000e+00 : f32
    %88 = vector.broadcast %cst_30 : f32 to vector<8x128xf32>
    %89 = arith.select %87, %77, %88 : vector<8x128xi1>, vector<8x128xf32>
    %90 = vector.shape_cast %89 : vector<8x128xf32> to vector<1x8x128xf32>
    %cst_31 = arith.constant dense<0.000000e+00> : vector<8x128xf32>
    %91 = vector.multi_reduction <add>, %90, %cst_31 [0] : vector<1x8x128xf32> to vector<8x128xf32>
    %c0_32 = arith.constant 0 : index
    %c0_33 = arith.constant 0 : index
    %92 = vector.load %arg3[%c0_32, %c0_33] : memref<8x128xf32, #tpu.memory_space<vmem>>, vector<8x128xf32>
    tpu.vector_store %arg3[%c0_32, %c0_33], %91 {strides = array<i32>} : memref<8x128xf32, #tpu.memory_space<vmem>>, vector<8x128xf32>,
    return
  }
  func.func @transform_0(%arg0: i32) -> (i32, i32, i32) {
    %c0_i32 = arith.constant 0 : i32
    %c0_i32_0 = arith.constant 0 : i32
    %c0_i32_1 = arith.constant 0 : i32
    return %c0_i32, %arg0, %c0_i32_0 : i32, i32, i32
  }
  func.func @transform_1(%arg0: i32) -> (i32, i32, i32) {
    %c0_i32 = arith.constant 0 : i32
    %c0_i32_0 = arith.constant 0 : i32
    %c0_i32_1 = arith.constant 0 : i32
    return %c0_i32, %arg0, %c0_i32_0 : i32, i32, i32
  }
  func.func @transform_2(%arg0: i32) -> (i32, i32) {
    %c0_i32 = arith.constant 0 : i32
    %c0_i32_0 = arith.constant 0 : i32
    return %arg0, %c0_i32 : i32, i32
  }
}

</mosaic_0001>

<bundles_post_ra>
// kernel: diou_loss.1
= control target key start
LH: loop header
LB: loop body
LE: loop exit
PB: predicated region body
PF: predicated region fallthrough
CT: control target
= control target key end

     0   :  { %v83_v49 = vlaneseq  ;;  %s155_s0 = inlined_call_operand.vmem [shape: f32[4,8,128], index: 0, kind: input, shape index: {}]   ;;  %s156_s1 = inlined_call_operand.vmem [shape: f32[4,8,128], index: 1, kind: input, shape index: {}]   ;;  %s157_s2 = inlined_call_operand.vmem [shape: f32[8,128], index: 2, kind: output, shape index: {}]  }
   0x1   :  { %v11_v0 = vld [vmem:[%s155_s0] sm:$0xff]  ;;  %v100_v1 = vld [vmem:[%s155_s0 + $0x8] sm:$0xff]  ;;  %v101_v2 = vld [vmem:[%s155_s0 + $0x10] sm:$0xff] }
   0x2   :  { %v102_v3 = vld [vmem:[%s155_s0 + $0x18] sm:$0xff]  ;;  %v18_v4 = vld [vmem:[%s156_s1] sm:$0xff]  ;;  %v103_v5 = vld [vmem:[%s156_s1 + $0x8] sm:$0xff]  ;;  %v25_v6 = vsub.f32 %v101_v2, %v11_v0  ;;  %v84_v50 = vshrl.u32 %v83_v49, 7  ;;  %v86_v57 = vand.u32 127, %v83_v49 }
   0x3   :  { %v104_v7 = vld [vmem:[%s156_s1 + $0x10] sm:$0xff]  ;;  %v105_v8 = vld [vmem:[%s156_s1 + $0x18] sm:$0xff]  ;;  %v26_v9 = vsub.f32 %v102_v3, %v100_v1  ;;  %v34_v10 = vmax.f32 %v11_v0, %v18_v4  ;;  %v38_v11 = vmax.f32 %v100_v1, %v103_v5  ;;  %v54_v12 = vmin.f32 %v11_v0, %v18_v4 }
   0x4   :  { %v29_v13 = vsub.f32 %v104_v7, %v18_v4  ;;  %v30_v14 = vsub.f32 %v105_v8, %v103_v5  ;;  %v33_v15 = vmin.f32 %v101_v2, %v104_v7  ;;  %v37_v16 = vmin.f32 %v102_v3, %v105_v8 }
   0x5   :  { %v27_v17 = vmul.f32 %v26_v9, %v25_v6  ;;  %v45_v18 = vadd.f32 %v104_v7, %v18_v4  ;;  %v49_v19 = vadd.f32 %v105_v8, %v103_v5  ;;  %v53_v20 = vmax.f32 %v101_v2, %v104_v7 }
   0x6   :  { %v31_v21 = vmul.f32 %v30_v14, %v29_v13  ;;  %v35_v22 = vsub.f32 %v33_v15, %v34_v10  ;;  %v39_v23 = vsub.f32 %v37_v16, %v38_v11  ;;  %v56_v24 = vmax.f32 %v102_v3, %v105_v8 }
   0x7   :  { %v28_v25 = vand.u32 2147483647, %v27_v17  ;;  %v46_v26 = vsub.f32 %v45_v18, %v101_v2  ;;  %v50_v27 = vsub.f32 %v49_v19, %v102_v3  ;;  %v55_v28 = vsub.f32 %v53_v20, %v54_v12 }
   0x8   :  { %v32_v29 = vand.u32 2147483647, %v31_v21  ;;  %v36_v30 = vmax.f32 %v35_v22, 0.0  ;;  %v40_v31 = vmax.f32 %v39_v23, 0.0  ;;  %v57_v32 = vmin.f32 %v100_v1, %v103_v5 }
   0x9   :  { %v47_v33 = vsub.f32 %v46_v26, %v11_v0  ;;  %v51_v34 = vsub.f32 %v50_v27, %v100_v1  ;;  %v70_v38 = vmul.f32 %v55_v28, %v55_v28  ;;  %v90_v58 = vmul.u32 128, %v84_v50 }
   0xa   :  { %v41_v35 = vmul.f32 %v40_v31, %v36_v30  ;;  %v42_v36 = vadd.f32 %v32_v29, %v28_v25  ;;  %v58_v37 = vsub.f32 %v56_v24, %v57_v32 }
   0xb   :  { %v48_v39 = vmul.f32 0.5, %v47_v33  ;;  %v52_v40 = vmul.f32 0.5, %v51_v34  ;;  %v91_v0 = vadd.s32 %v90_v58, %v86_v57 }
   0xc   :  { %v43_v41 = vsub.f32 %v42_v36, %v41_v35  ;;  %v71_v42 = vmul.f32 %v58_v37, %v58_v37 }
   0xd   :  { %v59_v43 = vmul.f32 %v48_v39, %v48_v39  ;;  %v60_v44 = vmul.f32 %v52_v40, %v52_v40  ;;  %vm92_vm2 = vcmp.lt.s32.totalorder %v91_v0, 32 }
   0xe   :  { %v44_v45 = vmax.f32 %v43_v41, 0.0  ;;  %v72_v46 = vadd.f32 %v71_v42, %v70_v38 }
   0xf   :  { %v61_v47 = vadd.f32 %v60_v44, %v59_v43 }
  0x10   :  { %107 = vrsqrt.f32 %v72_v46  ;;  %v75_v48 = vadd.f32 1e-06, %v44_v45 }
  0x11   :  { %109 = vrsqrt.f32 %v61_v47  ;;  %vm64_vm0 = vcmp.eq.f32.partialorder %v61_v47, inf  ;;  %v67_v53 = vand.u32 2147483648, %v61_v47  ;;  %vm66_vm1 = vcmp.eq.f32.partialorder %v61_v47, 0.0 }
  0x12   :  { %111 = vrcp.f32 %v75_v48 }
  0x1a   :  { %v108_v51 = vpop.eup %107 }
  0x1b   :  { %v110_v52 = vpop.eup %109  ;;  %v74_v60 = vmin.f32 %v108_v51, 1000000.0 }
  0x1c   :  { %v112_v54 = vpop.eup %111  ;;  %v63_v55 = vmul.f32 %v110_v52, %v61_v47 }
  0x1d   :  { %v77_v56 = vmul.f32 %v112_v54, %v41_v35 }
  0x1e   :  { %v65_v59 = vsel %vm64_vm0, %v61_v47, %v63_v55 }
  0x1f   :  { %v68_v61 = vsel %vm66_vm1, %v67_v53, %v65_v59  ;;  %v78_v63 = vsub.f32 1.0, %v77_v56 }
  0x20   :  { %v69_v62 = vmax.f32 %v68_v61, 1e-06 }
  0x22   :  { %v79_v1 = vmul.f32 %v74_v60, %v69_v62 }
  0x24   :  { %v80_v2 = vadd.f32 %v79_v1, %v78_v63 }
  0x26   :  { %v106_v3 = vclamps-f32 %v80_v2, 1.0 }
  0x28   :  { %v93_v4 = vsel %vm92_vm2, %v106_v3, 0.0 }
  0x29   :  { %95 = vst [vmem:[%s157_s2] sm:$0xff] %v93_v4 }

</bundles_post_ra>
